<compile_context>
chip_gen: v6e
topology: v6e:2x2x1
jax: 0.10.0
libtpu: 0.0.40
codegen_flags: <defaults>
</compile_context>

<pallas_src>
import functools

import jax
import jax.numpy as jnp
from jax import lax
from jax.experimental import pallas as pl
from jax.experimental.pallas import tpu as pltpu


def _round_up(x: int, m: int) -> int:
    return (x + m - 1) // m * m


def _pad2d(a, rows, cols, dtype):
    """Cast and zero-pad a 2-D array up to (rows, cols); no-op if already sized."""
    a = a.astype(dtype)
    pr, pc = rows - a.shape[0], cols - a.shape[1]
    if pr or pc:
        a = jnp.pad(a, ((0, pr), (0, pc)))
    return a


def _mlp_body(x_ref, w1_ref, b1_ref, w2_ref, b2_ref, bits_ref, o_ref, acc_ref, *, p):
    k = pl.program_id(1)

    @pl.when(k == 0)
    def _():
        acc_ref[...] = jnp.zeros_like(acc_ref)

    # First linear, K-tiled: contract x[TB, TK] with w1[Hid_p, TK] along TK
    # (native nn.Linear [out, in] layout -> no transpose anywhere).
    acc_ref[...] += lax.dot_general(
        x_ref[...], w1_ref[...],
        dimension_numbers=(((1,), (1,)), ((), ())),
        preferred_element_type=jnp.float32)            # [TB, Hid_p] f32

    @pl.when(k == pl.num_programs(1) - 1)
    def _():
        h = acc_ref[...] + b1_ref[...]                 # broadcast [1, Hid_p]

        if bits_ref is not None:                       # training-mode dropout
            if p >= 1.0:
                h = jnp.zeros_like(h)
            elif p > 0.0:
                thresh = jnp.uint32(min(int(p * (2 ** 32)), 2 ** 32 - 1))
                keep = bits_ref[...] >= thresh         # P(keep) = 1 - p
                h = jnp.where(keep, h * (1.0 / (1.0 - p)), 0.0)

        h = jnp.maximum(h, 0.0)                        # ReLU (f32, VPU)

        # Second linear: h[TB, Hid_p] x w2[Ncls_p, Hid_p] contracted along Hid_p.
        o = lax.dot_general(
            h.astype(jnp.bfloat16), w2_ref[...],
            dimension_numbers=(((1,), (1,)), ((), ())),
            preferred_element_type=jnp.float32)        # [TB, Ncls_p] f32
        o_ref[...] = o + b2_ref[...]


def _mlp_eval_kernel(x_ref, w1_ref, b1_ref, w2_ref, b2_ref, o_ref, acc_ref):
    _mlp_body(x_ref, w1_ref, b1_ref, w2_ref, b2_ref, None, o_ref, acc_ref, p=0.0)


def _mlp_train_kernel(x_ref, w1_ref, b1_ref, w2_ref, b2_ref, bits_ref, o_ref,
                      acc_ref, *, p):
    _mlp_body(x_ref, w1_ref, b1_ref, w2_ref, b2_ref, bits_ref, o_ref, acc_ref, p=p)


def mlp3_forward(x_nchw, w1, b1, w2, b2, *, training=False, p=0.5, seed=0,
                 max_tk=2048):
    """x_nchw: [B, C, H, W].  w1: [Hid, Din], b1: [Hid], w2: [Ncls, Hid],
       b2: [Ncls] -- exactly nn.Linear parameter shapes."""
    B = x_nchw.shape[0]
    x_flat = x_nchw.reshape(B, -1)                     # nn.Flatten (row-major)
    d_in = x_flat.shape[1]
    hid = w1.shape[0]
    n_cls = w2.shape[0]

    LANE = 128
    hid_p = _round_up(hid, LANE)
    ncls_p = _round_up(n_cls, LANE)

    # Batch tiling: lane-dense, sublane-aligned tiles on a 'parallel' grid axis.
    tb = 128 if B >= 128 else _round_up(B, 8)
    b_p = _round_up(B, tb)

    # Input-feature (reduction) tiling on an 'arbitrary' grid axis.
    d_in_p = _round_up(d_in, LANE)
    tk = d_in_p if d_in_p <= max_tk else max_tk
    d_in_p = _round_up(d_in_p, tk)
    nk = d_in_p // tk

    grid = (b_p // tb, nk)

    # Pad + cast (layout plumbing only; every pad is a no-op when already
    # aligned, e.g. d_in=1024 here).  If weights are reused across calls,
    # hoist this prep out of the per-call path.
    x_p = _pad2d(x_flat, b_p, d_in_p, jnp.bfloat16)
    w1_p = _pad2d(w1, hid_p, d_in_p, jnp.bfloat16)
    b1_p = _pad2d(b1.reshape(1, -1), 1, hid_p, jnp.float32)
    w2_p = _pad2d(w2, ncls_p, hid_p, jnp.bfloat16)
    b2_p = _pad2d(b2.reshape(1, -1), 1, ncls_p, jnp.float32)

    in_specs = [
        pl.BlockSpec((tb, tk), lambda i, k: (i, k)),        # x tile, pipelined
        pl.BlockSpec((hid_p, tk), lambda i, k: (0, k)),     # w1 tile (resident if nk==1)
        pl.BlockSpec((1, hid_p), lambda i, k: (0, 0)),      # b1, VMEM-resident
        pl.BlockSpec((ncls_p, hid_p), lambda i, k: (0, 0)), # w2, VMEM-resident
        pl.BlockSpec((1, ncls_p), lambda i, k: (0, 0)),     # b2, VMEM-resident
    ]
    inputs = [x_p, w1_p, b1_p, w2_p, b2_p]

    if training and p > 0.0:
        # TODO(synk): torch.nn.Dropout RNG is not reproduced bit-exactly; the
        # keep mask is sampled from jax.random (same Bernoulli(1-p) distribution).
        key = jax.random.PRNGKey(seed)
        bits = jax.random.bits(key, (b_p, hid_p), dtype=jnp.uint32)
        in_specs.append(pl.BlockSpec((tb, hid_p), lambda i, k: (i, 0)))
        inputs.append(bits)
        kernel = functools.partial(_mlp_train_kernel, p=p)
    else:
        kernel = _mlp_eval_kernel

    out_p = pl.pallas_call(
        kernel,
        out_shape=jax.ShapeDtypeStruct((b_p, ncls_p), jnp.float32),
        grid_spec=pltpu.PrefetchScalarGridSpec(
            num_scalar_prefetch=0,
            grid=grid,
            in_specs=in_specs,
            out_specs=pl.BlockSpec((tb, ncls_p), lambda i, k: (i, 0)),
            scratch_shapes=[pltpu.VMEM((tb, hid_p), jnp.float32)],
        ),
        compiler_params=pltpu.CompilerParams(
            dimension_semantics=("parallel", "arbitrary"),
            vmem_limit_bytes=32 * 1024 * 1024),
    )(*inputs)

    return out_p[:B, :n_cls]


def _reference(x_nchw, w1, b1, w2, b2):
    # Pure-JAX eval-mode reference (dropout is identity in eval).
    x = x_nchw.reshape(x_nchw.shape[0], -1)
    h = jnp.maximum(x @ w1.T + b1, 0.0)
    return h @ w2.T + b2


if __name__ == "__main__":
    # Shapes consistent with the module: B=2, C=4, H=W=16 -> input_size=1024.
    B, C, H, W = 2, 4, 16, 16
    input_size = C * H * W
    hidden_size = 32
    num_classes = 10

    key = jax.random.PRNGKey(0)
    kx, k1, kb1, k2, kb2 = jax.random.split(key, 5)

    x = jax.random.normal(kx, (B, C, H, W), dtype=jnp.float32)
    w1 = jax.random.normal(k1, (hidden_size, input_size), dtype=jnp.float32) * 0.02
    b1 = jax.random.normal(kb1, (hidden_size,), dtype=jnp.float32) * 0.02
    w2 = jax.random.normal(k2, (num_classes, hidden_size), dtype=jnp.float32) * 0.02
    b2 = jax.random.normal(kb2, (num_classes,), dtype=jnp.float32) * 0.02

    ref = _reference(x, w1, b1, w2, b2)

    # Eval-mode forward (deterministic; dropout is identity). Single K step.
    out = jax.block_until_ready(mlp3_forward(x, w1, b1, w2, b2, training=False))
    assert out.shape == (B, num_classes)
    assert jnp.allclose(out, ref, atol=1e-2, rtol=1e-2), "mismatch vs reference (nk=1)"

    # Same forward with the K-reduction path forced on (4 K steps) to exercise
    # the accumulator/epilogue machinery.
    out_kt = jax.block_until_ready(
        mlp3_forward(x, w1, b1, w2, b2, training=False, max_tk=256))
    assert jnp.allclose(out_kt, ref, atol=1e-2, rtol=1e-2), "mismatch vs reference (nk=4)"

    # Training path (stochastic dropout via integer-threshold mask).
    out_train = jax.block_until_ready(
        mlp3_forward(x, w1, b1, w2, b2, training=True, p=0.5, seed=123))
    assert out_train.shape == (B, num_classes)
    assert bool(jnp.all(jnp.isfinite(out_train)))

    print("KERNEL_OK")
</pallas_src>

<mosaic_0001>
module attributes {stable_mosaic.version = 11 : i64} {
  func.func @_mlp_eval_kernel(%arg0: i32, %arg1: i32, %arg2: memref<8x1024xbf16, #tpu.memory_space<vmem>>, %arg3: memref<128x1024xbf16, #tpu.memory_space<vmem>>, %arg4: memref<1x128xf32, #tpu.memory_space<vmem>>, %arg5: memref<128x128xbf16, #tpu.memory_space<vmem>>, %arg6: memref<1x128xf32, #tpu.memory_space<vmem>>, %arg7: memref<8x128xf32, #tpu.memory_space<vmem>>, %arg8: memref<8x128xf32, #tpu.memory_space<vmem>>) attributes {dimension_semantics = [#tpu.dimension_semantics<parallel>, #tpu.dimension_semantics<arbitrary>], iteration_bounds = array<i64: 1, 1>, scalar_prefetch = 0 : i64, scratch_operands = 1 : i64, tpu.core_type = #tpu.core_type<tc>, window_params = [{transform_indices = @transform_0, window_bounds = array<i64: 8, 1024>}, {transform_indices = @transform_1, window_bounds = array<i64: 128, 1024>}, {pipeline_mode = #tpu.pipeline_mode<synchronous>, transform_indices = @transform_2, window_bounds = array<i64: 1, 128>}, {pipeline_mode = #tpu.pipeline_mode<synchronous>, transform_indices = @transform_3, window_bounds = array<i64: 128, 128>}, {pipeline_mode = #tpu.pipeline_mode<synchronous>, transform_indices = @transform_4, window_bounds = array<i64: 1, 128>}, {transform_indices = @transform_5, window_bounds = array<i64: 8, 128>}]} {
    %c0_i32 = arith.constant 0 : i32
    %0 = arith.cmpi eq, %arg1, %c0_i32 : i32
    %1 = arith.extui %0 : i1 to i32
    %c0_i32_0 = arith.constant 0 : i32
    %2 = arith.cmpi ne, %1, %c0_i32_0 : i32
    scf.if %2 {
      %cst_10 = arith.constant 0.000000e+00 : f32
      %12 = vector.broadcast %cst_10 : f32 to vector<8x128xf32>
      %c0_11 = arith.constant 0 : index
      %c0_12 = arith.constant 0 : index
      %13 = vector.load %arg8[%c0_11, %c0_12] : memref<8x128xf32, #tpu.memory_space<vmem>>, vector<8x128xf32>
      tpu.vector_store %arg8[%c0_11, %c0_12], %12 {strides = array<i32>} : memref<8x128xf32, #tpu.memory_space<vmem>>, vector<8x128xf32>,
    } else {
    }
    %c0 = arith.constant 0 : index
    %c0_1 = arith.constant 0 : index
    %3 = vector.load %arg8[%c0, %c0_1] : memref<8x128xf32, #tpu.memory_space<vmem>>, vector<8x128xf32>
    %c0_2 = arith.constant 0 : index
    %c0_3 = arith.constant 0 : index
    %4 = vector.load %arg2[%c0_2, %c0_3] : memref<8x1024xbf16, #tpu.memory_space<vmem>>, vector<8x1024xbf16>
    %c0_4 = arith.constant 0 : index
    %c0_5 = arith.constant 0 : index
    %5 = vector.load %arg3[%c0_4, %c0_5] : memref<128x1024xbf16, #tpu.memory_space<vmem>>, vector<128x1024xbf16>
    %cst = arith.constant dense<0.000000e+00> : vector<8x128xf32>
    %6 = tpu.matmul %4, %5, %cst {dimension_numbers = #tpu.dot_dimension_numbers<[1], [1], [0], [0], [0, 0, 1, 0], [], []>} : vector<8x1024xbf16>, vector<128x1024xbf16>, vector<8x128xf32> -> vector<8x128xf32>
    %7 = arith.addf %3, %6 : vector<8x128xf32>
    %c0_6 = arith.constant 0 : index
    %c0_7 = arith.constant 0 : index
    %8 = vector.load %arg8[%c0_6, %c0_7] : memref<8x128xf32, #tpu.memory_space<vmem>>, vector<8x128xf32>
    tpu.vector_store %arg8[%c0_6, %c0_7], %7 {strides = array<i32>} : memref<8x128xf32, #tpu.memory_space<vmem>>, vector<8x128xf32>,
    %c0_i32_8 = arith.constant 0 : i32
    %9 = arith.cmpi eq, %arg1, %c0_i32_8 : i32
    %10 = arith.extui %9 : i1 to i32
    %c0_i32_9 = arith.constant 0 : i32
    %11 = arith.cmpi ne, %10, %c0_i32_9 : i32
    scf.if %11 {
      %c0_10 = arith.constant 0 : index
      %c0_11 = arith.constant 0 : index
      %12 = vector.load %arg8[%c0_10, %c0_11] : memref<8x128xf32, #tpu.memory_space<vmem>>, vector<8x128xf32>
      %c0_12 = arith.constant 0 : index
      %c0_13 = arith.constant 0 : index
      %13 = vector.load %arg4[%c0_12, %c0_13] : memref<1x128xf32, #tpu.memory_space<vmem>>, vector<1x128xf32>
      %14 = vector.broadcast %13 : vector<1x128xf32> to vector<8x128xf32>
      %15 = arith.addf %12, %14 : vector<8x128xf32>
      %cst_14 = arith.constant 0.000000e+00 : f32
      %16 = vector.broadcast %cst_14 : f32 to vector<8x128xf32>
      %17 = arith.maximumf %15, %16 : vector<8x128xf32>
      %18 = arith.truncf %17 : vector<8x128xf32> to vector<8x128xbf16>
      %c0_15 = arith.constant 0 : index
      %c0_16 = arith.constant 0 : index
      %19 = vector.load %arg5[%c0_15, %c0_16] : memref<128x128xbf16, #tpu.memory_space<vmem>>, vector<128x128xbf16>
      %cst_17 = arith.constant dense<0.000000e+00> : vector<8x128xf32>
      %20 = tpu.matmul %18, %19, %cst_17 {dimension_numbers = #tpu.dot_dimension_numbers<[1], [1], [0], [0], [0, 0, 1, 0], [], []>} : vector<8x128xbf16>, vector<128x128xbf16>, vector<8x128xf32> -> vector<8x128xf32>
      %c0_18 = arith.constant 0 : index
      %c0_19 = arith.constant 0 : index
      %21 = vector.load %arg6[%c0_18, %c0_19] : memref<1x128xf32, #tpu.memory_space<vmem>>, vector<1x128xf32>
      %22 = vector.broadcast %21 : vector<1x128xf32> to vector<8x128xf32>
      %23 = arith.addf %20, %22 : vector<8x128xf32>
      %c0_20 = arith.constant 0 : index
      %c0_21 = arith.constant 0 : index
      %24 = vector.load %arg7[%c0_20, %c0_21] : memref<8x128xf32, #tpu.memory_space<vmem>>, vector<8x128xf32>
      tpu.vector_store %arg7[%c0_20, %c0_21], %23 {strides = array<i32>} : memref<8x128xf32, #tpu.memory_space<vmem>>, vector<8x128xf32>,
    } else {
    }
    return
  }
  func.func @transform_0(%arg0: i32, %arg1: i32) -> (i32, i32) {
    %c0_i32 = arith.constant 0 : i32
    return %arg0, %arg1 : i32, i32
  }
  func.func @transform_1(%arg0: i32, %arg1: i32) -> (i32, i32) {
    %c0_i32 = arith.constant 0 : i32
    %c0_i32_0 = arith.constant 0 : i32
    return %c0_i32, %arg1 : i32, i32
  }
  func.func @transform_2(%arg0: i32, %arg1: i32) -> (i32, i32) {
    %c0_i32 = arith.constant 0 : i32
    %c0_i32_0 = arith.constant 0 : i32
    %c0_i32_1 = arith.constant 0 : i32
    return %c0_i32, %c0_i32_0 : i32, i32
  }
  func.func @transform_3(%arg0: i32, %arg1: i32) -> (i32, i32) {
    %c0_i32 = arith.constant 0 : i32
    %c0_i32_0 = arith.constant 0 : i32
    %c0_i32_1 = arith.constant 0 : i32
    return %c0_i32, %c0_i32_0 : i32, i32
  }
  func.func @transform_4(%arg0: i32, %arg1: i32) -> (i32, i32) {
    %c0_i32 = arith.constant 0 : i32
    %c0_i32_0 = arith.constant 0 : i32
    %c0_i32_1 = arith.constant 0 : i32
    return %c0_i32, %c0_i32_0 : i32, i32
  }
  func.func @transform_5(%arg0: i32, %arg1: i32) -> (i32, i32) {
    %c0_i32 = arith.constant 0 : i32
    %c0_i32_0 = arith.constant 0 : i32
    return %arg0, %c0_i32 : i32, i32
  }
}

</mosaic_0001>

<bundles_post_ra>
// kernel: tpu_custom_call.1
= control target key start
LH: loop header
LB: loop body
LE: loop exit
PB: predicated region body
PF: predicated region fallthrough
CT: control target
= control target key end

     0   :  { %10 = vsyncpa [#allocation4], 0  ;;  %s1092_s0 = inlined_call_operand.hbm [shape: bf16[8,1024], index: 0, kind: input, shape index: {}]   ;;  %s1093_s1 = inlined_call_operand.hbm [shape: bf16[128,1024], index: 1, kind: input, shape index: {}]   ;;  %s1094_s2 = inlined_call_operand.vmem [shape: f32[1,128], index: 2, kind: input, shape index: {}]   ;;  %s1095_s3 = inlined_call_operand.hbm [shape: bf16[128,128], index: 3, kind: input, shape index: {}]   ;;  %s1096_s4 = inlined_call_operand.vmem [shape: f32[1,128], index: 4, kind: input, shape index: {}]   ;;  %s1097_s5 = inlined_call_operand.hbm [shape: f32[8,128], index: 5, kind: output, shape index: {}]  }
   0x1   :  { %11 = vsyncpa [#allocation7], 0 }
   0x2   :  { %12 = vsyncpa [#allocation5], 0  ;;  %s1010_s18 = smov [#allocation6]  }
   0x3   :  { %s28_s19 = sshll.u32 %s1010_s18, 4  ;;  %s29_s19 = int_to_ptr.vmem [resolvable:$true] %s28_s19 }
   0x4   :  { %s932_s20 = scalar_lea.vmem %s29_s19, 8192  ;;  %p937_p1 = scmp.lt.s32.totalorder %s29_s19, %s29_s19 }
   0x5   :  { %p933_p0 = scmp.ne.s32.totalorder %s29_s19, %s932_s20  ;;  %p938_p2 = scmp.lt.s32.totalorder %s932_s20, %s932_s20 }
   0x7   :  { %p939_p3 = por %p938_p2, %p937_p1 }
   0x9   :  { %p940_p4 = pnand %p939_p3, %p933_p0 }
   0xb   :  { %943 = shalt.err (!%p940_p4)
}
   0xc   :  { %s1011_s21 = smov 512   ;;  %s1012_s22 = smov 32  }
   0xd   :  { %34 = dma.hbm_to_vmem [thread:$0]  %s1093_s1, 8192, %s29_s19, [#allocation7], %s1011_s21, %s1011_s21, %s1012_s22  }
   0xe   :  { %s1013_s25 = smov [#allocation3]   ;;  %s1014_s27 = smov [#allocation8]  }
   0xf   :  { %s19_s26 = sshll.u32 %s1013_s25, 4  ;;  %s42_s28 = sshll.u32 %s1014_s27, 4  ;;  %s20_s26 = int_to_ptr.vmem [resolvable:$true] %s19_s26  ;;  %s43_s28 = int_to_ptr.vmem [resolvable:$true] %s42_s28 }
  0x10   :  { %s952_s29 = scalar_lea.vmem %s20_s26, 512  ;;  %p957_p6 = scmp.lt.s32.totalorder %s20_s26, %s20_s26 }
  0x11   :  { %p953_p5 = scmp.ne.s32.totalorder %s20_s26, %s952_s29  ;;  %p958_p7 = scmp.lt.s32.totalorder %s952_s29, %s952_s29 }
  0x13   :  { %p959_p8 = por %p958_p7, %p957_p6 }
  0x15   :  { %p960_p9 = pnand %p959_p8, %p953_p5 }
  0x17   :  { %963 = shalt.err (!%p960_p9)
}
  0x18   :  { %22 = dma.hbm_to_vmem [thread:$0]  %s1092_s0, 512, %s20_s26, [#allocation4]  }
  0x19   :  { %s972_s7 = scalar_lea.vmem %s43_s28, 1024  ;;  %p977_p11 = scmp.lt.s32.totalorder %s43_s28, %s43_s28 }
  0x1a   :  { %p973_p10 = scmp.ne.s32.totalorder %s43_s28, %s972_s7  ;;  %p978_p12 = scmp.lt.s32.totalorder %s972_s7, %s972_s7 }
  0x1c   :  { %p979_p13 = por %p978_p12, %p977_p11 }
  0x1e   :  { %p980_p0 = pnand %p979_p13, %p973_p10 }
  0x20   :  { %983 = shalt.err (!%p980_p0)
}
  0x21   :  { %s1015_s1 = smov 64   ;;  %s1016_s8 = smov 4  }
  0x22   :  { %48 = dma.hbm_to_vmem [thread:$0]  %s1095_s3, 1024, %s43_s28, [#allocation7], %s1015_s1, %s1015_s1, %s1016_s8  }
  0x23   :  { %1004 = dma.done.wait [#allocation4], 512  }
  0x24   :  { %1005 = vsyncadd [#allocation4], 4294966784 }
  0x25   :  { %1006 = dma.done.wait [#allocation7], 9216  }
  0x26   :  { %1007 = vsyncadd [#allocation7], 4294958080  ;;  %v127_v0 = vld [vmem:[#allocation6 + $0x1c0] sm:$0xff]  ;;  %v128_v2 = vld [vmem:[#allocation6 + $0x1c8] sm:$0xff]  ;;  %vm1018_vm0 = vmmov 0   ;;  %s1019_s13 = smov [#allocation9]  }
  0x27   :  { %v131_v1 = vld [vmem:[#allocation6 + $0x1e0] sm:$0xff]  ;;  %v132_v4 = vld [vmem:[#allocation6 + $0x1e8] sm:$0xff]  ;;  %s777_s14 = sshll.u32 %s1019_s13, 4  ;;  %s778_s14 = int_to_ptr.vmem [resolvable:$true] %s777_s14 }
  0x28   :  { %v852_v3 = vcombine.high %v127_v0, %v131_v1  ;;  %v851_v5 = vcombine.low %v127_v0, %v131_v1  ;;  %v119_v6 = vld [vmem:[#allocation6 + $0x180] sm:$0xff]  ;;  %v854_v8 = vcombine.high %v128_v2, %v132_v4  ;;  %v853_v9 = vcombine.low %v128_v2, %v132_v4  ;;  %v120_v11 = vld [vmem:[#allocation6 + $0x188] sm:$0xff]  ;;  %v129_v2 = vld [vmem:[#allocation6 + $0x1d0] sm:$0xff]  ;;  %p989_p2 = scmp.lt.s32.totalorder %s778_s14, %s778_s14 }
  0x29   :  { %v123_v7 = vld [vmem:[#allocation6 + $0x1a0] sm:$0xff]  ;;  %v124_v12 = vld [vmem:[#allocation6 + $0x1a8] sm:$0xff]  ;;  %v130_v4 = vld [vmem:[#allocation6 + $0x1d8] sm:$0xff] }
  0x2a   :  { %v844_v10 = vcombine.high %v119_v6, %v123_v7  ;;  %483 = vmatprep.subr.bf16.mxu0 %v852_v3  ;;  %v846_v13 = vcombine.high %v120_v11, %v124_v12  ;;  %523 = vmatprep.subr.bf16.mxu1 %v854_v8  ;;  %v111_v14 = vld [vmem:[#allocation6 + $0x140] sm:$0xff]  ;;  %v112_v16 = vld [vmem:[#allocation6 + $0x148] sm:$0xff]  ;;  %v843_v18 = vcombine.low %v119_v6, %v123_v7  ;;  %v133_v3 = vld [vmem:[#allocation6 + $0x1f0] sm:$0xff] }
  0x2b   :  { %484 = vmatpush1.bf16.xpose.msra.mxu0 %v851_v5  ;;  %524 = vmatpush1.bf16.xpose.msra.mxu1 %v853_v9  ;;  %v115_v15 = vld [vmem:[#allocation6 + $0x160] sm:$0xff]  ;;  %v116_v17 = vld [vmem:[#allocation6 + $0x168] sm:$0xff]  ;;  %v845_v19 = vcombine.low %v120_v11, %v124_v12  ;;  %v134_v5 = vld [vmem:[#allocation6 + $0x1f8] sm:$0xff]  ;;  %v856_v8 = vcombine.high %v129_v2, %v133_v3 }
  0x2c   :  { %485 = vmatprep.subr.bf16.mxu0 %v844_v10  ;;  %525 = vmatprep.subr.bf16.mxu1 %v846_v13  ;;  %v836_v20 = vcombine.high %v111_v14, %v115_v15  ;;  %v838_v21 = vcombine.high %v112_v16, %v116_v17  ;;  %v1059_v22 = vld [vmem:[#allocation3] sm:$0xff]  ;;  %v1063_v24 = vld [vmem:[#allocation3 + $0x8] sm:$0xff]  ;;  %v835_v30 = vcombine.low %v111_v14, %v115_v15  ;;  %v121_v10 = vld [vmem:[#allocation6 + $0x190] sm:$0xff] }
  0x2d   :  { %v788_v23 = vcombine.high %v1059_v22, %v1059_v22  ;;  %v790_v25 = vcombine.high %v1063_v24, %v1063_v24  ;;  %v103_v26 = vld [vmem:[#allocation6 + $0x100] sm:$0xff]  ;;  %v104_v28 = vld [vmem:[#allocation6 + $0x108] sm:$0xff]  ;;  %v837_v31 = vcombine.low %v112_v16, %v116_v17  ;;  %v858_v9 = vcombine.high %v130_v4, %v134_v5  ;;  %v125_v11 = vld [vmem:[#allocation6 + $0x1b0] sm:$0xff] }
  0x2e   :  { %v107_v27 = vld [vmem:[#allocation6 + $0x120] sm:$0xff]  ;;  %v108_v29 = vld [vmem:[#allocation6 + $0x128] sm:$0xff]  ;;  %v787_v12 = vcombine.low %v1059_v22, %v1059_v22  ;;  %v122_v13 = vld [vmem:[#allocation6 + $0x198] sm:$0xff]  ;;  %v789_v16 = vcombine.low %v1063_v24, %v1063_v24  ;;  %v855_v17 = vcombine.low %v129_v2, %v133_v3 }
  0x2f   :  { %515 = vmatprep.mubr.bf16.mxu0 %v788_v23  ;;  %555 = vmatprep.mubr.bf16.mxu1 %v790_v25  ;;  %v828_v32 = vcombine.high %v103_v26, %v107_v27  ;;  %v830_v33 = vcombine.high %v104_v28, %v108_v29  ;;  %v95_v34 = vld [vmem:[#allocation6 + $0xc0] sm:$0xff]  ;;  %v96_v36 = vld [vmem:[#allocation6 + $0xc8] sm:$0xff]  ;;  %v827_v38 = vcombine.low %v103_v26, %v107_v27  ;;  %v126_v14 = vld [vmem:[#allocation6 + $0x1b8] sm:$0xff] }
  0x30   :  { %v99_v35 = vld [vmem:[#allocation6 + $0xe0] sm:$0xff]  ;;  %v100_v37 = vld [vmem:[#allocation6 + $0xe8] sm:$0xff]  ;;  %v829_v39 = vcombine.low %v104_v28, %v108_v29  ;;  %v1069_v15 = vld [vmem:[#allocation3 + $0x10] sm:$0xff]  ;;  %v847_v28 = vcombine.low %v121_v10, %v125_v11  ;;  %v849_v29 = vcombine.low %v122_v13, %v126_v14 }
  0x31   :  { %v820_v40 = vcombine.high %v95_v34, %v99_v35  ;;  %v822_v41 = vcombine.high %v96_v36, %v100_v37  ;;  %v87_v42 = vld [vmem:[#allocation6 + $0x80] sm:$0xff]  ;;  %v88_v44 = vld [vmem:[#allocation6 + $0x88] sm:$0xff]  ;;  %v819_v46 = vcombine.low %v95_v34, %v99_v35  ;;  %v821_v47 = vcombine.low %v96_v36, %v100_v37  ;;  %v113_v25 = vld [vmem:[#allocation6 + $0x150] sm:$0xff] }
  0x32   :  { %v91_v43 = vld [vmem:[#allocation6 + $0xa0] sm:$0xff]  ;;  %v92_v45 = vld [vmem:[#allocation6 + $0xa8] sm:$0xff]  ;;  %v792_v23 = vcombine.high %v1069_v15, %v1069_v15  ;;  %v117_v24 = vld [vmem:[#allocation6 + $0x170] sm:$0xff] }
  0x33   :  { %486 = vmatpush1.bf16.xpose.msra.mxu0 %v843_v18  ;;  %526 = vmatpush1.bf16.xpose.msra.mxu1 %v845_v19  ;;  %v812_v48 = vcombine.high %v87_v42, %v91_v43  ;;  %v814_v49 = vcombine.high %v88_v44, %v92_v45  ;;  %v79_v50 = vld [vmem:[#allocation6 + $0x40] sm:$0xff]  ;;  %v80_v52 = vld [vmem:[#allocation6 + $0x48] sm:$0xff]  ;;  %v811_v54 = vcombine.low %v87_v42, %v91_v43  ;;  %v1073_v18 = vld [vmem:[#allocation3 + $0x18] sm:$0xff] }
  0x34   :  { %487 = vmatprep.subr.bf16.mxu0 %v836_v20  ;;  %527 = vmatprep.subr.bf16.mxu1 %v838_v21  ;;  %v83_v51 = vld [vmem:[#allocation6 + $0x60] sm:$0xff]  ;;  %v84_v53 = vld [vmem:[#allocation6 + $0x68] sm:$0xff]  ;;  %v813_v55 = vcombine.low %v88_v44, %v92_v45  ;;  %v857_v19 = vcombine.low %v130_v4, %v134_v5  ;;  %v848_v20 = vcombine.high %v121_v10, %v125_v11  ;;  %v114_v26 = vld [vmem:[#allocation6 + $0x158] sm:$0xff] }
  0x35   :  { %v804_v56 = vcombine.high %v79_v50, %v83_v51  ;;  %v806_v57 = vcombine.high %v80_v52, %v84_v53  ;;  %v71_v58 = vld [vmem:[#allocation6] sm:$0xff]  ;;  %v72_v60 = vld [vmem:[#allocation6 + $0x8] sm:$0xff]  ;;  %v803_v62 = vcombine.low %v79_v50, %v83_v51  ;;  %v805_v63 = vcombine.low %v80_v52, %v84_v53  ;;  %v118_v27 = vld [vmem:[#allocation6 + $0x178] sm:$0xff] }
  0x36   :  { %v75_v59 = vld [vmem:[#allocation6 + $0x20] sm:$0xff]  ;;  %v76_v61 = vld [vmem:[#allocation6 + $0x28] sm:$0xff]  ;;  %v850_v21 = vcombine.high %v122_v13, %v126_v14  ;;  %v794_v22 = vcombine.high %v1073_v18, %v1073_v18  ;;  %v106_v34 = vld [vmem:[#allocation6 + $0x118] sm:$0xff]  ;;  %v839_v36 = vcombine.low %v113_v25, %v117_v24  ;;  %v841_v37 = vcombine.low %v114_v26, %v118_v27 }
  0x37   :  { %v796_v0 = vcombine.high %v71_v58, %v75_v59  ;;  %v798_v1 = vcombine.high %v72_v60, %v76_v61  ;;  %v795_v6 = vcombine.low %v71_v58, %v75_v59  ;;  %v797_v7 = vcombine.low %v72_v60, %v76_v61  ;;  %v110_v35 = vld [vmem:[#allocation6 + $0x138] sm:$0xff]  ;;  %v917_v14 = vld [vmem:[#allocation8 + $0x30] sm:$0xff]  }
  0x38   :  { %v98_v42 = vld [vmem:[#allocation6 + $0xd8] sm:$0xff]  ;;  %v833_v45 = vcombine.low %v106_v34, %v110_v35  ;;  %v791_v10 = vcombine.low %v1069_v15, %v1069_v15  ;;  %v793_v11 = vcombine.low %v1073_v18, %v1073_v18  ;;  %v1017_v13 = vmov 0.0   ;;  %v921_v18 = vld [vmem:[#allocation8 + $0x10] sm:$0xff]  }
  0x39   :  { %v102_v43 = vld [vmem:[#allocation6 + $0xf8] sm:$0xff] }
  0x3a   :  { %v90_v50 = vld [vmem:[#allocation6 + $0x98] sm:$0xff]  ;;  %v825_v53 = vcombine.low %v98_v42, %v102_v43 }
  0x3b   :  { %488 = vmatpush1.bf16.xpose.msra.mxu0 %v835_v30  ;;  %528 = vmatpush1.bf16.xpose.msra.mxu1 %v837_v31  ;;  %v840_v30 = vcombine.high %v113_v25, %v117_v24  ;;  %v842_v31 = vcombine.high %v114_v26, %v118_v27  ;;  %v94_v51 = vld [vmem:[#allocation6 + $0xb8] sm:$0xff] }
  0x3c   :  { %489 = vmatprep.subr.bf16.mxu0 %v828_v32  ;;  %529 = vmatprep.subr.bf16.mxu1 %v830_v33  ;;  %v105_v32 = vld [vmem:[#allocation6 + $0x110] sm:$0xff]  ;;  %v82_v58 = vld [vmem:[#allocation6 + $0x58] sm:$0xff]  ;;  %v817_v61 = vcombine.low %v90_v50, %v94_v51 }
  0x3d   :  { %v109_v33 = vld [vmem:[#allocation6 + $0x130] sm:$0xff]  ;;  %v86_v59 = vld [vmem:[#allocation6 + $0x78] sm:$0xff] }
  0x3e   :  { %v831_v44 = vcombine.low %v105_v32, %v109_v33  ;;  %v74_v2 = vld [vmem:[#allocation6 + $0x18] sm:$0xff]  ;;  %v809_v5 = vcombine.low %v82_v58, %v86_v59 }
  0x3f   :  { %v78_v3 = vld [vmem:[#allocation6 + $0x38] sm:$0xff] }
  0x40   :  { %v920_v15 = vld [vmem:[#allocation8 + $0x18] sm:$0xff]  }
  0x43   :  { %490 = vmatpush1.bf16.xpose.msra.mxu0 %v827_v38  ;;  %530 = vmatpush1.bf16.xpose.msra.mxu1 %v829_v39  ;;  %v832_v38 = vcombine.high %v105_v32, %v109_v33  ;;  %v834_v39 = vcombine.high %v106_v34, %v110_v35  ;;  %v859_v33 = vld [vmem:[%s1094_s2] ss:$0 sm:$0xff]  ;;  %s984_s2 = scalar_lea.vmem %s778_s14, 128 }
  0x44   :  { %491 = vmatprep.subr.bf16.mxu0 %v820_v40  ;;  %531 = vmatprep.subr.bf16.mxu1 %v822_v41  ;;  %v97_v40 = vld [vmem:[#allocation6 + $0xd0] sm:$0xff]  ;;  %p985_p1 = scmp.ne.s32.totalorder %s778_s14, %s984_s2  ;;  %p990_p3 = scmp.lt.s32.totalorder %s984_s2, %s984_s2 }
  0x45   :  { %v101_v41 = vld [vmem:[#allocation6 + $0xf0] sm:$0xff] }
  0x46   :  { %v823_v52 = vcombine.low %v97_v40, %v101_v41  ;;  %p991_p4 = por %p990_p3, %p989_p2 }
  0x48   :  { %p992_p5 = pnand %p991_p4, %p985_p1 }
  0x4b   :  { %492 = vmatpush1.bf16.xpose.msra.mxu0 %v819_v46  ;;  %532 = vmatpush1.bf16.xpose.msra.mxu1 %v821_v47  ;;  %v824_v46 = vcombine.high %v97_v40, %v101_v41  ;;  %v826_v47 = vcombine.high %v98_v42, %v102_v43 }
  0x4c   :  { %493 = vmatprep.subr.bf16.mxu0 %v812_v48  ;;  %533 = vmatprep.subr.bf16.mxu1 %v814_v49  ;;  %v89_v48 = vld [vmem:[#allocation6 + $0x90] sm:$0xff] }
  0x4d   :  { %v93_v49 = vld [vmem:[#allocation6 + $0xb0] sm:$0xff] }
  0x4e   :  { %v815_v60 = vcombine.low %v89_v48, %v93_v49 }
  0x53   :  { %494 = vmatpush1.bf16.xpose.msra.mxu0 %v811_v54  ;;  %534 = vmatpush1.bf16.xpose.msra.mxu1 %v813_v55  ;;  %v816_v54 = vcombine.high %v89_v48, %v93_v49  ;;  %v818_v55 = vcombine.high %v90_v50, %v94_v51 }
  0x54   :  { %495 = vmatprep.subr.bf16.mxu0 %v804_v56  ;;  %535 = vmatprep.subr.bf16.mxu1 %v806_v57  ;;  %v81_v56 = vld [vmem:[#allocation6 + $0x50] sm:$0xff] }
  0x55   :  { %v85_v57 = vld [vmem:[#allocation6 + $0x70] sm:$0xff] }
  0x56   :  { %v807_v4 = vcombine.low %v81_v56, %v85_v57 }
  0x5b   :  { %496 = vmatpush1.bf16.xpose.msra.mxu0 %v803_v62  ;;  %536 = vmatpush1.bf16.xpose.msra.mxu1 %v805_v63  ;;  %v808_v62 = vcombine.high %v81_v56, %v85_v57  ;;  %v810_v63 = vcombine.high %v82_v58, %v86_v59 }
  0x5c   :  { %497 = vmatprep.subr.bf16.mxu0 %v796_v0  ;;  %537 = vmatprep.subr.bf16.mxu1 %v798_v1  ;;  %v73_v0 = vld [vmem:[#allocation6 + $0x10] sm:$0xff] }
  0x5d   :  { %v77_v1 = vld [vmem:[#allocation6 + $0x30] sm:$0xff] }
  0x63   :  { %498 = vmatpush1.bf16.xpose.msra.mxu0 %v795_v6  ;;  %538 = vmatpush1.bf16.xpose.msra.mxu1 %v797_v7  ;;  %v800_v6 = vcombine.high %v73_v0, %v77_v1  ;;  %v802_v7 = vcombine.high %v74_v2, %v78_v3 }
  0x64   :  { %563 = vmatprep.subr.bf16.mxu0 %v856_v8  ;;  %603 = vmatprep.subr.bf16.mxu1 %v858_v9  ;;  %v799_v8 = vcombine.low %v73_v0, %v77_v1  ;;  %v801_v9 = vcombine.low %v74_v2, %v78_v3 }
  0x6a   :  { %516 = vmatmul.mubr.bf16.vlgmr.msra.gmra.mxu0 %v787_v12  ;;  %556 = vmatmul.mubr.bf16.vlgmr.msra.gmra.mxu1 %v789_v16  ;;  %v916_v12 = vld [vmem:[#allocation8 + $0x38] sm:$0xff]   ;;  %v918_v16 = vld [vmem:[#allocation8 + $0x28] sm:$0xff]  }
  0x6b   :  { %564 = vmatpush1.bf16.xpose.msra.mxu0 %v855_v17  ;;  %604 = vmatpush1.bf16.xpose.msra.mxu1 %v857_v19  ;;  %v919_v17 = vld [vmem:[#allocation8 + $0x20] sm:$0xff]   ;;  %v922_v19 = vld [vmem:[#allocation8 + $0x8] sm:$0xff]  }
  0x6c   :  { %565 = vmatprep.subr.bf16.mxu0 %v848_v20  ;;  %605 = vmatprep.subr.bf16.mxu1 %v850_v21  ;;  %v923_v20 = vld [vmem:[#allocation8] sm:$0xff]  }
  0x6d   :  { %595 = vmatprep.mubr.bf16.mxu0 %v792_v23  ;;  %635 = vmatprep.mubr.bf16.mxu1 %v794_v22 }
  0x73   :  { %566 = vmatpush1.bf16.xpose.msra.mxu0 %v847_v28  ;;  %606 = vmatpush1.bf16.xpose.msra.mxu1 %v849_v29 }
  0x74   :  { %567 = vmatprep.subr.bf16.mxu0 %v840_v30  ;;  %607 = vmatprep.subr.bf16.mxu1 %v842_v31 }
  0x7b   :  { %568 = vmatpush1.bf16.xpose.msra.mxu0 %v839_v36  ;;  %608 = vmatpush1.bf16.xpose.msra.mxu1 %v841_v37 }
  0x7c   :  { %569 = vmatprep.subr.bf16.mxu0 %v832_v38  ;;  %609 = vmatprep.subr.bf16.mxu1 %v834_v39 }
  0x83   :  { %570 = vmatpush1.bf16.xpose.msra.mxu0 %v831_v44  ;;  %610 = vmatpush1.bf16.xpose.msra.mxu1 %v833_v45  ;;  %v860_v44 = vld [vmem:[%s1096_s4] ss:$0 sm:$0xff] }
  0x84   :  { %571 = vmatprep.subr.bf16.mxu0 %v824_v46  ;;  %611 = vmatprep.subr.bf16.mxu1 %v826_v47 }
  0x8b   :  { %572 = vmatpush1.bf16.xpose.msra.mxu0 %v823_v52  ;;  %612 = vmatpush1.bf16.xpose.msra.mxu1 %v825_v53 }
  0x8c   :  { %573 = vmatprep.subr.bf16.mxu0 %v816_v54  ;;  %613 = vmatprep.subr.bf16.mxu1 %v818_v55 }
  0x93   :  { %574 = vmatpush1.bf16.xpose.msra.mxu0 %v815_v60  ;;  %614 = vmatpush1.bf16.xpose.msra.mxu1 %v817_v61 }
  0x94   :  { %575 = vmatprep.subr.bf16.mxu0 %v808_v62  ;;  %615 = vmatprep.subr.bf16.mxu1 %v810_v63 }
  0x9b   :  { %576 = vmatpush1.bf16.xpose.msra.mxu0 %v807_v4  ;;  %616 = vmatpush1.bf16.xpose.msra.mxu1 %v809_v5 }
  0x9c   :  { %577 = vmatprep.subr.bf16.mxu0 %v800_v6  ;;  %617 = vmatprep.subr.bf16.mxu1 %v802_v7 }
  0xa3   :  { %578 = vmatpush1.bf16.xpose.msra.mxu0 %v799_v8  ;;  %618 = vmatpush1.bf16.xpose.msra.mxu1 %v801_v9 }
  0xa4   :  { %878 = vmatprep.subr.bf16.mxu0 %v1017_v13 }
  0xaa   :  { %596 = vmatmul.mubr.bf16.vlgmr.msra.gmra.mxu0 %v791_v10  ;;  %636 = vmatmul.mubr.bf16.vlgmr.msra.gmra.mxu1 %v793_v11 }
  0xab   :  { %879 = vmatpush3.bf16.xpose.msra.mxu0 %v916_v12  ;;  %894 = vmatprep.mubr.msk.bf16.mxu0 %vm1018_vm0, %v1017_v13 }
  0xac   :  { %880 = vmatprep.subr.bf16.mxu0 %v1017_v13 }
  0xb3   :  { %881 = vmatpush3.bf16.xpose.msra.mxu0 %v917_v14 }
  0xb4   :  { %882 = vmatprep.subr.bf16.mxu0 %v1017_v13 }
  0xbb   :  { %883 = vmatpush3.bf16.xpose.msra.mxu0 %v918_v16 }
  0xbc   :  { %884 = vmatprep.subr.bf16.mxu0 %v1017_v13 }
  0xc3   :  { %885 = vmatpush3.bf16.xpose.msra.mxu0 %v919_v17 }
  0xc4   :  { %886 = vmatprep.subr.bf16.mxu0 %v1017_v13 }
  0xcb   :  { %887 = vmatpush3.bf16.xpose.msra.mxu0 %v920_v15 }
  0xcc   :  { %888 = vmatprep.subr.bf16.mxu0 %v1017_v13 }
  0xd3   :  { %889 = vmatpush3.bf16.xpose.msra.mxu0 %v921_v18 }
  0xd4   :  { %890 = vmatprep.subr.bf16.mxu0 %v1017_v13 }
  0xdb   :  { %891 = vmatpush3.bf16.xpose.msra.mxu0 %v922_v19 }
  0xdc   :  { %892 = vmatprep.subr.bf16.mxu0 %v1017_v13 }
  0xe3   :  { %893 = vmatpush3.bf16.xpose.msra.mxu0 %v923_v20 }
 0x12a   :  { %v517_v21 = vpop.f32.mrf.mxu0  ;;  %v557_v23 = vpop.f32.mrf.mxu1 }
 0x12b   :  { %v558_v29 = vadd.f32 %v557_v23, %v517_v21 }
 0x12c   :  { %v519_v22 = vpop.f32.mrf.mxu0  ;;  %v559_v25 = vpop.f32.mrf.mxu1 }
 0x12e   :  { %v520_v24 = vpop.f32.mrf.mxu0  ;;  %v560_v26 = vpop.f32.mrf.mxu1 }
 0x130   :  { %v521_v27 = vpop.f32.mrf.mxu0  ;;  %v561_v28 = vpop.f32.mrf.mxu1 }
 0x16a   :  { %v597_v30 = vpop.f32.mrf.mxu0  ;;  %v637_v32 = vpop.f32.mrf.mxu1 }
 0x16b   :  { %v598_v31 = vadd.f32 %v597_v30, %v558_v29 }
 0x16c   :  { %v599_v34 = vpop.f32.mrf.mxu0  ;;  %v639_v36 = vpop.f32.mrf.mxu1 }
 0x16d   :  { %v638_v35 = vadd.f32 %v637_v32, %v598_v31 }
 0x16e   :  { %v600_v37 = vpop.f32.mrf.mxu0  ;;  %v640_v39 = vpop.f32.mrf.mxu1 }
 0x16f   :  { %v656_v38 = vadd.f32 %v859_v33, %v638_v35 }
 0x170   :  { %v601_v40 = vpop.f32.mrf.mxu0  ;;  %v641_v42 = vpop.f32.mrf.mxu1 }
 0x171   :  { %v657_v41 = vmax.f32 %v656_v38, 0.0 }
 0x173   :  { %v658_v43 = vpack.c.bf16 %v657_v41, %v657_v41 }
 0x175   :  { %895 = vmatmul.mubr.bf16.vlgmr.msra.gmra.mxu0 %v658_v43 }
 0x235   :  { %v764_v45 = vpop.f32.mrf.mxu0 }
 0x236   :  { %v765_v46 = vadd.f32 %v860_v44, %v764_v45 }
 0x237   :  { %v896_v47 = vpop.f32.mrf.mxu0 }
 0x238   :  { %770 = vst [vmem:[#allocation9] sm:$0xff] %v765_v46 }
 0x239   :  { %v767_v48 = vpop.f32.mrf.mxu0 }
 0x23a   :  { %995 = shalt.err (!%p992_p5)
}
 0x23b   :  { %780 = dma.vmem_to_hbm [thread:$0]  %s778_s14, 128, %s1097_s5, [#allocation5]   ;;  %v897_v49 = vpop.f32.mrf.mxu0 }
 0x23c   :  { %1008 = dma.done.wait [#allocation5], 128  }
 0x23d   :  { %1009 = vsyncadd [#allocation5], 4294967168 }
 0x23e   :  { %784 = vsyncpa [#allocation4], 1 }
 0x23f   :  { %785 = vsyncpa [#allocation7], 1 }
 0x240   :  { %786 = vsyncpa [#allocation5], 1 }

</bundles_post_ra>
